<compile_context>
chip_gen: v7x
topology: tpu7x:2x2x1
jax: 0.10.0
libtpu: 0.0.40
codegen_flags: <defaults>
</compile_context>

<pallas_src>
import math

import jax
import jax.numpy as jnp
from jax.experimental import pallas as pl
from jax.experimental.pallas import tpu as pltpu


def _round_up(a: int, b: int) -> int:
    return (a + b - 1) // b * b


def _sample_normal_kernel(mu_ref, log_sigma_ref, z_ref, out_ref, sigma_ref):
    # grid = (num_b_tiles, k)
    #   axis 0 ("parallel"):  tiles of the flattened batch
    #   axis 1 ("arbitrary"): sample index k; carries the sigma scratch
    @pl.when(pl.program_id(1) == 0)
    def _():
        # exp(log_sigma) is identical for every sample k of this batch tile:
        # compute it once per tile and reuse it for all k samples.
        sigma_ref[...] = jnp.exp(log_sigma_ref[...].astype(jnp.float32))

    mu = mu_ref[...].astype(jnp.float32)
    z = z_ref[0].astype(jnp.float32)
    out_ref[0] = (mu + z * sigma_ref[...]).astype(out_ref.dtype)


def sample_normal(x, dim: int, k: int, seed: int = 0):
    """Pallas implementation of SampleNormal.forward.

    x: array with shape (..., 2*dim).
    returns: array with shape (k, ..., dim), = mu + randn * exp(log_sigma).
    """
    assert x.shape[-1] == 2 * dim, "last dim must be 2*dim"
    lead = x.shape[:-1]
    b = math.prod(lead) if lead else 1
    mu = x[..., :dim].reshape(b, dim)
    log_sigma = x[..., dim:].reshape(b, dim)

    # Lane-dense feature axis: pad dim up to a multiple of 128.
    dim_p = _round_up(dim, 128)
    # Batch tile: multiple of 8 (f32 sublane); target ~1 MiB per (tb, dim_p)
    # f32 block to amortize per-grid-step overhead while keeping total VMEM
    # (double-buffered mu/log_sigma/z/out + sigma scratch ~ 9 blocks) far
    # below the 32 MiB scoped default on v5e/v6e/v7x.
    tb = max(8, min(1024, (1 << 20) // (dim_p * 4)))
    tb = _round_up(tb, 8)
    tb = min(tb, _round_up(b, 8))
    b_p = _round_up(b, tb)
    num_b_tiles = b_p // tb

    # Zero-pad: padded rows have mu=0, sigma=exp(0)=1, z drawn but discarded.
    mu_p = jnp.pad(mu, ((0, b_p - b), (0, dim_p - dim)))
    ls_p = jnp.pad(log_sigma, ((0, b_p - b), (0, dim_p - dim)))

    # TODO(synk): on real TPU hardware the noise could be generated in-kernel
    # via pltpu.prng_seed / pltpu.prng_random_bits + Box-Muller (using both
    # cos and sin outputs) to avoid this HBM read, but those primitives are
    # unsupported under the generic Pallas interpreter used for verification,
    # so the standard-normal noise is drawn here instead.
    z = jax.random.normal(jax.random.PRNGKey(seed), (k, b_p, dim_p),
                          dtype=jnp.float32)

    itemsize = jnp.dtype(x.dtype).itemsize
    cost = pl.CostEstimate(
        flops=2 * k * b_p * dim_p,                       # FMA per output elt
        transcendentals=b_p * dim_p,                     # exp, hoisted over k
        bytes_accessed=(2 * b_p * dim_p * itemsize       # mu + log_sigma in
                        + k * b_p * dim_p * 4            # noise in
                        + k * b_p * dim_p * itemsize),   # samples out
    )

    out = pl.pallas_call(
        _sample_normal_kernel,
        out_shape=jax.ShapeDtypeStruct((k, b_p, dim_p), x.dtype),
        grid_spec=pltpu.PrefetchScalarGridSpec(
            num_scalar_prefetch=0,
            grid=(num_b_tiles, k),
            in_specs=[
                pl.BlockSpec((tb, dim_p), lambda j, i: (j, 0)),        # mu
                pl.BlockSpec((tb, dim_p), lambda j, i: (j, 0)),        # log_sigma
                pl.BlockSpec((1, tb, dim_p), lambda j, i: (i, j, 0)),  # z
            ],
            out_specs=pl.BlockSpec((1, tb, dim_p), lambda j, i: (i, j, 0)),
            scratch_shapes=[pltpu.VMEM((tb, dim_p), jnp.float32)],     # sigma
        ),
        compiler_params=pltpu.CompilerParams(
            # batch tiles are independent -> shard across TCs (v7x megacore);
            # k carries the sigma scratch -> must stay "arbitrary".
            dimension_semantics=("parallel", "arbitrary"),
        ),
        cost_estimate=cost,
    )(mu_p, ls_p, z)

    out = out[:, :b, :dim]
    return out.reshape((k,) + lead + (dim,))


if __name__ == "__main__":
    key = jax.random.PRNGKey(0)
    DIM = 128          # model dim (mu / log_sigma width)
    K = 4              # number of samples
    # x: (batch=2, groups=4, 2*dim) -- arbitrary leading dims, channels-last.
    x = jax.random.normal(key, (2, 4, 2 * DIM), dtype=jnp.float32) * 0.1

    samples = sample_normal(x, dim=DIM, k=K, seed=1234)
    samples = jax.block_until_ready(samples)

    # Sanity checks: shape, finiteness; standardized residuals ~ N(0, 1).
    assert samples.shape == (K, 2, 4, DIM), samples.shape
    assert bool(jnp.all(jnp.isfinite(samples)))
    mu = x[..., :DIM]
    sigma = jnp.exp(x[..., DIM:])
    z = (samples - mu[None]) / sigma[None]
    assert abs(float(jnp.mean(z))) < 0.2
    assert 0.7 < float(jnp.std(z)) < 1.3

    print("KERNEL_OK")
</pallas_src>

<mosaic_0001>
module attributes {stable_mosaic.version = 11 : i64} {
  func.func @_sample_normal_kernel(%arg0: i32, %arg1: i32, %arg2: memref<8x128xf32, #tpu.memory_space<vmem>>, %arg3: memref<8x128xf32, #tpu.memory_space<vmem>>, %arg4: memref<1x8x128xf32, #tpu.memory_space<vmem>>, %arg5: memref<1x8x128xf32, #tpu.memory_space<vmem>>, %arg6: memref<8x128xf32, #tpu.memory_space<vmem>>) attributes {dimension_semantics = [#tpu.dimension_semantics<parallel>, #tpu.dimension_semantics<arbitrary>], iteration_bounds = array<i64: 1, 4>, scalar_prefetch = 0 : i64, scratch_operands = 1 : i64, tpu.core_type = #tpu.core_type<tc>, window_params = [{transform_indices = @transform_0, window_bounds = array<i64: 8, 128>}, {transform_indices = @transform_1, window_bounds = array<i64: 8, 128>}, {transform_indices = @transform_2, window_bounds = array<i64: 1, 8, 128>}, {transform_indices = @transform_3, window_bounds = array<i64: 1, 8, 128>}]} {
    %c0_i32 = arith.constant 0 : i32
    %0 = arith.cmpi eq, %arg1, %c0_i32 : i32
    %1 = arith.extui %0 : i1 to i32
    %c0_i32_0 = arith.constant 0 : i32
    %2 = arith.cmpi ne, %1, %c0_i32_0 : i32
    scf.if %2 {
      %c0_10 = arith.constant 0 : index
      %c0_11 = arith.constant 0 : index
      %12 = vector.load %arg3[%c0_10, %c0_11] : memref<8x128xf32, #tpu.memory_space<vmem>>, vector<8x128xf32>
      %13 = math.exp %12 : vector<8x128xf32>
      %c0_12 = arith.constant 0 : index
      %c0_13 = arith.constant 0 : index
      %14 = vector.load %arg6[%c0_12, %c0_13] : memref<8x128xf32, #tpu.memory_space<vmem>>, vector<8x128xf32>
      tpu.vector_store %arg6[%c0_12, %c0_13], %13 {strides = array<i32>} : memref<8x128xf32, #tpu.memory_space<vmem>>, vector<8x128xf32>,
    } else {
    }
    %c0 = arith.constant 0 : index
    %c0_1 = arith.constant 0 : index
    %3 = vector.load %arg2[%c0, %c0_1] : memref<8x128xf32, #tpu.memory_space<vmem>>, vector<8x128xf32>
    %c0_2 = arith.constant 0 : index
    %c0_3 = arith.constant 0 : index
    %c0_4 = arith.constant 0 : index
    %4 = vector.load %arg4[%c0_2, %c0_3, %c0_4] : memref<1x8x128xf32, #tpu.memory_space<vmem>>, vector<1x8x128xf32>
    %5 = vector.shape_cast %4 : vector<1x8x128xf32> to vector<8x128xf32>
    %c0_5 = arith.constant 0 : index
    %c0_6 = arith.constant 0 : index
    %6 = vector.load %arg6[%c0_5, %c0_6] : memref<8x128xf32, #tpu.memory_space<vmem>>, vector<8x128xf32>
    %7 = arith.mulf %5, %6 : vector<8x128xf32>
    %8 = arith.addf %3, %7 : vector<8x128xf32>
    %c0_7 = arith.constant 0 : index
    %c0_8 = arith.constant 0 : index
    %c0_9 = arith.constant 0 : index
    %9 = vector.load %arg5[%c0_7, %c0_8, %c0_9] : memref<1x8x128xf32, #tpu.memory_space<vmem>>, vector<1x8x128xf32>
    %10 = vector.shape_cast %9 : vector<1x8x128xf32> to vector<8x128xf32>
    %11 = vector.shape_cast %8 : vector<8x128xf32> to vector<1x8x128xf32>
    tpu.vector_store %arg5[%c0_7, %c0_8, %c0_9], %11 {strides = array<i32>} : memref<1x8x128xf32, #tpu.memory_space<vmem>>, vector<1x8x128xf32>,
    return
  }
  func.func @transform_0(%arg0: i32, %arg1: i32) -> (i32, i32) {
    %c0_i32 = arith.constant 0 : i32
    %c0_i32_0 = arith.constant 0 : i32
    return %arg0, %c0_i32 : i32, i32
  }
  func.func @transform_1(%arg0: i32, %arg1: i32) -> (i32, i32) {
    %c0_i32 = arith.constant 0 : i32
    %c0_i32_0 = arith.constant 0 : i32
    return %arg0, %c0_i32 : i32, i32
  }
  func.func @transform_2(%arg0: i32, %arg1: i32) -> (i32, i32, i32) {
    %c0_i32 = arith.constant 0 : i32
    %c0_i32_0 = arith.constant 0 : i32
    return %arg1, %arg0, %c0_i32 : i32, i32, i32
  }
  func.func @transform_3(%arg0: i32, %arg1: i32) -> (i32, i32, i32) {
    %c0_i32 = arith.constant 0 : i32
    %c0_i32_0 = arith.constant 0 : i32
    return %arg1, %arg0, %c0_i32 : i32, i32, i32
  }
}

</mosaic_0001>

<bundles_post_ra>
// kernel: tpu_custom_call.1
= control target key start
LH: loop header
LB: loop body
LE: loop exit
PB: predicated region body
PF: predicated region fallthrough
CT: control target
= control target key end

     0   :  { %8 = vsyncpa [#allocation4], 0  ;;  %s914_s0 = inlined_call_operand.hbm [shape: f32[8,128], index: 0, kind: input, shape index: {}]   ;;  %s915_s1 = inlined_call_operand.hbm [shape: f32[8,128], index: 1, kind: input, shape index: {}]   ;;  %s916_s2 = inlined_call_operand.hbm [shape: f32[4,8,128], index: 2, kind: input, shape index: {}]   ;;  %s917_s3 = inlined_call_operand.hbm [shape: f32[4,8,128], index: 3, kind: output, shape index: {}]  }
   0x1   :  { %9 = vsyncpa [#allocation7], 0 }
   0x2   :  { %10 = vsyncpa [#allocation5], 0 }
   0x3   :  { %12 = vsyncpa [#allocation5 + $0x1], 0  ;;  %s677_s12 = smov 0   ;;  %s679_s13 = smov 0  }
   0x4   :  { %s681_s14 = smov 0   ;;  %s683_s15 = smov 0  }
   0x5   :  { %s685_s16 = smov 0   ;;  %s687_s17 = smov 0  }
   0x6 LB: > { %s708_s18 = sadd.s32 4294967295, %s651_s17   ;;  %s373_s19 = sadd.s32 4294967294, %s651_s17   ;;  %s651_s17 = sphi %s687_s17, %s18_s17   ;;  %s647_s16 = sphi %s685_s16, %s939_s16   ;;  %s643_s15 = sphi %s683_s15, %s938_s15   ;;  %s639_s14 = sphi %s681_s14, %s937_s14   ;;  %s635_s13 = sphi %s679_s13, %s936_s13   ;;  %s631_s12 = sphi %s677_s12, %s935_s12  }
   0x7   : > { %p104_p0 = scmp.ne.s32.totalorder %s635_s13, %s631_s12  ;;  %p918_p1 = scmp.eq.s32.totalorder %s708_s18, 0 }
   0x8   : > { %p136_p3 = scmp.eq.s32.totalorder %s373_s19, 3  ;;  %p374_p5 = scmp.ge.s32.totalorder %s651_s17, 1 }
   0x9   : > { %p717_p4 = por %p918_p1, %p104_p0  ;;  %p143_p7 = scmp.lt.s32.totalorder %s651_s17, 5 }
   0xa   : > { %p722_p6 = por %p136_p3, %p104_p0  ;;  %s653_s23 = smov [#allocation3]  }
   0xb   : > { %s921_s20 = scalar_select %p717_p4, 1, 0 }
   0xc   : > { %s922_s21 = scalar_select %p722_p6, 1, 0 }
   0xd   : > { %p727_p8 = pnand %p374_p5, %p143_p7  ;;  %s158_s24 = sshll.u32 %s653_s23, 4  ;;  %s159_s24 = int_to_ptr.vmem [resolvable:$true] %s158_s24 }
   0xe   : > { %s654_s25 = smov [#allocation6]   ;;  %s475_s30 = scalar_lea.hbm %s914_s0, 128 }
   0xf   : > { %s923_s22 = scalar_select %p727_p8, 1, 0 }
  0x10   : > { %p402_p9 = pneg %p727_p8  ;;  %s171_s26 = sshll.u32 %s654_s25, 4  ;;  %s739_s26 = int_to_ptr.vmem [resolvable:$true] %s171_s26 }
  0x11   : > { %p476_p11 = scmp.ne.s32.totalorder %s914_s0, %s475_s30  ;;  %p482_p3 = scmp.lt.u32.totalorder %s475_s30, %s914_s0 }
  0x12   : > { %p735_p10 = pnand %p402_p9, %p918_p1 }
  0x14   : > { %p477_p12 = pneg %p735_p10 }
  0x16   : > { %p478_p13 = pnand %p477_p12, %p476_p11 }
  0x18   : > { %p479_p0 = pneg %p478_p13 }
  0x1a   : > { %p484_p5 = pnand %p482_p3, %p479_p0 }
  0x1c   : > { %487 = shalt.err (!%p484_p5)
}
  0x1d   : > { %s488_s8 = scalar_lea.vmem %s159_s24, 128  ;;  %p496_p2 = scmp.lt.s32.totalorder %s159_s24, %s159_s24 }
  0x1e   : > { %p489_p7 = scmp.ne.s32.totalorder %s159_s24, %s488_s8  ;;  %p497_p6 = scmp.lt.s32.totalorder %s488_s8, %s488_s8 }
  0x20   : > { %p491_p9 = pnand %p489_p7, %p477_p12  ;;  %p498_p4 = por %p497_p6, %p496_p2 }
  0x22   : > { %p492_p1 = pneg %p491_p9 }
  0x24   : > { %p499_p8 = pnand %p498_p4, %p492_p1 }
  0x26   : > { %502 = shalt.err (!%p499_p8)
}
  0x27   : > { %405 = dma.hbm_to_vmem [thread:$0]  (!%p735_p10), %s914_s0, 128, %s159_s24, [#allocation4]  }
  0x28   : > { %s503_s23 = scalar_lea.hbm %s915_s1, 128 }
  0x29   : > { %p504_p11 = scmp.ne.s32.totalorder %s915_s1, %s503_s23  ;;  %p510_p4 = scmp.lt.u32.totalorder %s503_s23, %s915_s1 }
  0x2b   : > { %p506_p2 = pnand %p504_p11, %p477_p12 }
  0x2d   : > { %p507_p1 = pneg %p506_p2 }
  0x2f   : > { %p512_p6 = pnand %p510_p4, %p507_p1 }
  0x31   : > { %515 = shalt.err (!%p512_p6)
}
  0x32   : > { %s516_s24 = scalar_lea.vmem %s739_s26, 128  ;;  %p524_p3 = scmp.lt.s32.totalorder %s739_s26, %s739_s26 }
  0x33   : > { %p517_p8 = scmp.ne.s32.totalorder %s739_s26, %s516_s24  ;;  %p525_p5 = scmp.lt.s32.totalorder %s516_s24, %s516_s24 }
  0x35   : > { %p519_p13 = pnand %p517_p8, %p477_p12  ;;  %p526_p7 = por %p525_p5, %p524_p3 }
  0x37   : > { %p520_p0 = pneg %p519_p13 }
  0x39   : > { %p527_p9 = pnand %p526_p7, %p520_p0 }
  0x3b   : > { %530 = shalt.err (!%p527_p9)
}
  0x3c   : > { %408 = dma.hbm_to_vmem [thread:$0]  (!%p735_p10), %s915_s1, 128, %s739_s26, [#allocation7]  }
  0x3d   : > { %s27_s6 = sadd.s32 1, %s647_s16  ;;  %s91_s7 = sadd.s32 1, %s639_s14 }
  0x3e   : > { %p28_p12 = scmp.ge.s32.totalorder %s27_s6, 4  ;;  %p98_p11 = scmp.ne.s32.totalorder %s639_s14, %s635_s13 }
  0x3f   : > { %p99_p2 = scmp.eq.s32.totalorder %s651_s17, 0  ;;  %p419_p1 = scmp.lt.s32.totalorder %s651_s17, 4 }
  0x40   : > { %s941_s6 = smov (%p28_p12, %s27_s6), 0  ;;  %p925_p6 = scmp.eq.s32.totalorder %s708_s18, 3 }
  0x41   : > { %p100_p4 = por %p99_p2, %p98_p11  ;;  %s86_s8 = ssub.s32 %s647_s16, %s941_s6 }
  0x42   : > { %p798_p8 = por %p925_p6, %p98_p11  ;;  %s182_s9 = sand.u32 1, %s651_s17  }
  0x43   : > { %p89_p13 = scmp.eq.s32.totalorder %s86_s8, 0  ;;  %s184_s10 = sand.u32 1, %s639_s14  }
  0x44   : > { %s379_s26 = sshll.u32 %s647_s16, 7  ;;  %s378_s19 = sshll.u32 %s184_s10, 3 }
  0x45   : > { %s808_s11 = scalar_select %p89_p13, %s639_s14, %s91_s7  }
  0x46   : > { %s813_s28 = scalar_lea.hbm %s916_s2, %s379_s26  ;;  %p815_p10 = pnand %p419_p1, %p100_p4 }
  0x47   : > { %s186_s30 = scalar_lea.vmem [#allocation8], %s378_s19  ;;  %s183_s4 = scalar_lea.sflag [#allocation4], %s182_s9 }
  0x48   : > { %s194_s24 = sshll.u32 %s186_s30, 4  ;;  %s531_s5 = scalar_lea.hbm %s813_s28, 128  ;;  %s819_s24 = int_to_ptr.vmem [resolvable:$true] %s194_s24 }
  0x49   : > { %p532_p0 = scmp.ne.s32.totalorder %s813_s28, %s531_s5  ;;  %p533_p3 = pneg %p815_p10 }
  0x4a   : > { %s536_s10 = scalar_lea.hbm %s916_s2, 512  ;;  %p537_p9 = scmp.lt.u32.totalorder %s813_s28, %s916_s2 }
  0x4b   : > { %p534_p5 = pnand %p533_p3, %p532_p0  ;;  %p538_p12 = scmp.lt.u32.totalorder %s536_s10, %s531_s5 }
  0x4c   : > { %p540_p2 = scmp.lt.u32.totalorder %s531_s5, %s813_s28 }
  0x4d   : > { %p535_p7 = pneg %p534_p5  ;;  %p539_p11 = por %p538_p12, %p537_p9 }
  0x4f   : > { %p541_p1 = por %p540_p2, %p539_p11 }
  0x51   : > { %p542_p4 = pnand %p541_p1, %p535_p7 }
  0x53   : > { %545 = shalt.err (!%p542_p4)
}
  0x54   : > { %s546_s9 = scalar_lea.vmem %s819_s24, 128  ;;  %s655_s19 = smov [#allocation8]  }
  0x55   : > { %p547_p6 = scmp.ne.s32.totalorder %s819_s24, %s546_s9  ;;  %s551_s25 = sshll.u32 %s655_s19, 4  ;;  %s552_s25 = int_to_ptr.vmem [resolvable:$false] %s551_s25 }
  0x56   : > { %s553_s30 = scalar_lea.vmem %s552_s25, 256  ;;  %p554_p5 = scmp.lt.s32.totalorder %s819_s24, %s552_s25 }
  0x57   : > { %p549_p13 = pnand %p547_p6, %p533_p3  ;;  %p555_p9 = scmp.lt.s32.totalorder %s553_s30, %s546_s9 }
  0x59   : > { %p550_p0 = pneg %p549_p13  ;;  %p556_p12 = por %p555_p9, %p554_p5 }
  0x5b   : > { %p557_p11 = pnand %p556_p12, %p550_p0 }
  0x5d   : > { %560 = shalt.err (!%p557_p11)
}
  0x5e   : > { %412 = dma.hbm_to_vmem [thread:$0]  (!%p815_p10), %s813_s28, 128, %s819_s24, %s183_s4  }
  0x5f   : > { %p928_p7 = scmp.ne.s32.totalorder %s923_s22, 0 }
  0x60   : > { %p929_p3 = scmp.eq.s32.totalorder (!%p928_p7), %s708_s18, 0 }
  0x61   : > { %203 = sbr.rel (%p928_p7) target bundleno = 155 (0x9b), region = 32 }
  0x68   : > { %614 = dma.done.wait (%p929_p3), [#allocation4], 128   ;;  %p930_p2 = pmov %p929_p3 }
  0x6a   : > { %616 = vsyncadd (%p930_p2), [#allocation4], 4294967168  ;;  %p931_p1 = pmov %p930_p2 }
  0x6c   : > { %618 = dma.done.wait (%p931_p1), [#allocation7], 128   ;;  %p932_p4 = pmov %p931_p1 }
  0x6d   : > { %s213_s29 = sand.u32 1, %s708_s18   ;;  %s215_s28 = sand.u32 1, %s635_s13  }
  0x6e   : > { %620 = vsyncadd (%p932_p4), [#allocation7], 4294967168  ;;  %s383_s24 = sshll.u32 %s215_s28, 3  ;;  %s214_s22 = scalar_lea.sflag [#allocation4], %s213_s29 }
  0x6f   : > { %s217_s4 = scalar_lea.vmem [#allocation8], %s383_s24  ;;  %p933_p10 = scmp.ne.s32.totalorder %s921_s20, 0 }
  0x71   : > { %622 = dma.done.wait (%p933_p10), %s214_s22, 128  }
  0x72   : > { %624 = vsyncadd (%p933_p10), %s214_s22, 4294967168  ;;  %s239_s5 = scalar_lea.vmem [#allocation9], %s383_s24  ;;  %p385_p6 = scmp.ne.s32.totalorder %s643_s15, 0 }
  0x73   : > { %v244_v0 = vld [vmem:[#allocation6] sm:$0xff] (!%p385_p6) }
  0x74   : > { %243 = sbr.rel (%p385_p6) target bundleno = 130 (0x82), region = 48  ;;  %v245_v1 = vmul.f32 (!%p385_p6), 1.442695, %v244_v0 }
  0x76   : > { %473 = vpow2.f32 (!%p385_p6), %v245_v1 }
  0x80   : > { %v474_v2 = vpop.eup %473 }
  0x81   : > { %247 = vst [vmem:[#allocation2] sm:$0xff] %v474_v2 }
  0x82 PF: > { %v248_v3 = vld [vmem:[#allocation3] sm:$0xff]  ;;  %v249_v4 = vld [vmem:[%s217_s4] sm:$0xff]  ;;  %s387_s18 = sshll.u32 %s643_s15, 7  ;;  %s269_s7 = sshll.u32 %s239_s5, 4  ;;  %s869_s7 = int_to_ptr.vmem [resolvable:$true] %s269_s7 }
  0x83   : > { %s867_s10 = scalar_lea.hbm %s917_s3, %s387_s18  ;;  %s255_s26 = scalar_lea.sflag [#allocation5], %s215_s28 }
  0x84   : > { %s561_s23 = scalar_lea.vmem %s869_s7, 128  ;;  %s656_s15 = smov [#allocation9]  }
  0x85   : > { %p562_p13 = scmp.ne.s32.totalorder %s869_s7, %s561_s23  ;;  %s565_s9 = sshll.u32 %s656_s15, 4  ;;  %s566_s9 = int_to_ptr.vmem [resolvable:$false] %s565_s9 }
  0x86   : > { %s567_s19 = scalar_lea.vmem %s566_s9, 256  ;;  %p568_p9 = scmp.lt.s32.totalorder %s869_s7, %s566_s9 }
  0x87   : > { %p563_p0 = pnand %p562_p13, %p798_p8  ;;  %p569_p12 = scmp.lt.s32.totalorder %s567_s19, %s561_s23 }
  0x88   : > { %v250_v5 = vld [vmem:[#allocation2] sm:$0xff] }
  0x89   : > { %v251_v6 = vmul.f32 %v250_v5, %v249_v4  ;;  %p564_p5 = pneg %p563_p0  ;;  %p570_p11 = por %p569_p12, %p568_p9 }
  0x8b   : > { %v252_v7 = vadd.f32 %v251_v6, %v248_v3  ;;  %p571_p7 = pnand %p570_p11, %p564_p5 }
  0x8d   : > { %253 = vst [vmem:[%s239_s5] sm:$0xff] %v252_v7 }
  0x8e   : > { %574 = shalt.err (!%p571_p7)
}
  0x8f   : > { %s575_s25 = scalar_lea.hbm %s867_s10, 128  ;;  %s579_s28 = scalar_lea.hbm %s917_s3, 512 }
  0x90   : > { %p576_p3 = scmp.ne.s32.totalorder %s867_s10, %s575_s25  ;;  %p580_p4 = scmp.lt.u32.totalorder %s867_s10, %s917_s3 }
  0x91   : > { %p581_p10 = scmp.lt.u32.totalorder %s579_s28, %s575_s25  ;;  %p583_p13 = scmp.lt.u32.totalorder %s575_s25, %s867_s10 }
  0x92   : > { %p577_p2 = pnand %p576_p3, %p798_p8 }
  0x93   : > { %p582_p6 = por %p581_p10, %p580_p4 }
  0x94   : > { %p578_p1 = pneg %p577_p2 }
  0x95   : > { %p584_p0 = por %p583_p13, %p582_p6 }
  0x97   : > { %p585_p5 = pnand %p584_p0, %p578_p1 }
  0x99   : > { %588 = shalt.err (!%p585_p5)
}
  0x9a   : > { %400 = dma.vmem_to_hbm [thread:$0]  (%p798_p8), %s869_s7, 128, %s867_s10, %s255_s26  }
  0x9b PF: > { %p422_p9 = scmp.ge.s32.totalorder %s651_s17, 2  ;;  %s281_s4 = sand.u32 1, %s631_s12  }
  0x9c   : > { %p934_p12 = scmp.ne.s32.totalorder %s922_s21, 0  ;;  %s282_s5 = scalar_lea.sflag [#allocation5], %s281_s4 }
  0x9e   : > { %p414_p11 = pnand %p422_p9, %p934_p12 }
  0xa0   : > { %626 = dma.done.wait (!%p414_p11), %s282_s5, 128  }
  0xa1   : > { %628 = vsyncadd (!%p414_p11), %s282_s5, 4294967168  ;;  %s18_s17 = sadd.s32 1, %s651_s17   ;;  %s935_s12 = smov %s635_s13 }
  0xa2   : > { %p15_p7 = scmp.ge.s32.totalorder %s18_s17, 6   ;;  %s936_s13 = smov %s639_s14 }
  0xa3   : > { %s937_s14 = smov %s808_s11  ;;  %s938_s15 = smov %s647_s16 }
  0xa4   : > { %s939_s16 = smov %s941_s6  ;;  %17 = sbr.rel (!%p15_p7) target bundleno = 6 (0x6), region = 90 }
  0xab   :  { %287 = vsyncpa [#allocation4], 1 }
  0xac   :  { %289 = vsyncpa [#allocation4 + $0x1], 1 }
  0xad   :  { %290 = vsyncpa [#allocation7], 1 }
  0xae   :  { %291 = vsyncpa [#allocation5], 1 }
  0xaf   :  { %293 = vsyncpa [#allocation5 + $0x1], 1 }

</bundles_post_ra>
